<compile_context>
chip_gen: v7x
topology: tpu7x:2x2x1
jax: 0.10.0
libtpu: 0.0.40
codegen_flags: <defaults>
</compile_context>

<pallas_src>
import jax
import jax.numpy as jnp
import numpy as np
from jax import lax
from jax.experimental import pallas as pl
from jax.experimental.pallas import tpu as pltpu

_LANE = 128
_SUB = 8
_EDGE_UNROLL = 8          # edge tables are padded to a multiple of this


def _round_up(v, m):
    return ((v + m - 1) // m) * m


def _stack_planes(arrays, shape, dtype):
    """Zero-pad and stack per-plane 2-D arrays into a [P, d0_pad, d1_pad] slab."""
    out = jnp.zeros(shape, dtype)
    for i, a in enumerate(arrays):
        idx = (i,) + tuple(slice(0, int(s)) for s in a.shape)
        out = out.at[idx].set(jnp.asarray(a, dtype))
    return out


# ---------------------------------------------------------------------------
# Kernel A: fused nexus_up (per-plane scatter-sum onto nexus nodes)
#           + nexus_net MLP (Linear->Tanh->Linear->Tanh)
# grid = (P planes,)  -- plane axis accumulates into lin_acc => "arbitrary"
# ---------------------------------------------------------------------------
def _nexus_up_net_kernel(e_plane_ref, e_nexus_ref,            # SMEM scalar prefetch
                         x_ref, w1_ref, b1_ref, w2_ref, b2_ref,
                         n_ref,                                # output [M_pad, Fn_pad]
                         plane_acc, lin_acc):                  # VMEM f32 scratch
    p = pl.program_id(0)

    @pl.when(p == 0)
    def _():
        lin_acc[...] = jnp.zeros_like(lin_acc)

    # per-plane scatter-sum accumulator
    plane_acc[...] = jnp.zeros_like(plane_acc)

    num_edges = e_plane_ref.shape[1]        # static, padded to multiple of unroll

    def edge_block(blk, carry):
        base = blk * _EDGE_UNROLL
        for u in range(_EDGE_UNROLL):       # manual unroll: ILP on gathers
            e = base + u
            src = e_plane_ref[p, e]         # plane-node row (padded edges -> zero row)
            dst = e_nexus_ref[p, e]         # nexus-node row
            row = x_ref[pl.ds(src, 1), :]   # (1, Fp_pad) f32 gather
            plane_acc[pl.ds(dst, 1), :] += row
        return carry

    lax.fori_loop(0, num_edges // _EDGE_UNROLL, edge_block, 0)

    # Fold this plane's slice of the first nexus_net linear:
    #   lin_acc += (scatter_sum_p) @ W1[p]   (== ncat @ W1 after all planes)
    lin_acc[...] += jnp.dot(plane_acc[...].astype(jnp.bfloat16), w1_ref[...],
                            preferred_element_type=jnp.float32)

    @pl.when(p == pl.num_programs(0) - 1)
    def _():
        h = jnp.tanh(lin_acc[...] + b1_ref[...]).astype(jnp.bfloat16)
        n_ref[...] = jnp.tanh(
            jnp.dot(h, w2_ref[...], preferred_element_type=jnp.float32)
            + b2_ref[...]).astype(n_ref.dtype)


# ---------------------------------------------------------------------------
# Kernel C: NexusDown for all planes in one call.
# grid = (P planes [parallel], row tiles [arbitrary])
#   t == 0 : precompute per-node gate logits, then edge pass:
#            gate = sigmoid(xg[i] + ng[j]), scatter gate * n_j
#   every t: mean aggregation + node-update MLP on a lane-dense row tile
# ---------------------------------------------------------------------------
def _nexus_down_kernel(e_plane_ref, e_nexus_ref,               # SMEM scalar prefetch
                       x_ref, n_ref, dinv_ref,
                       wex_ref, wen_ref, be_ref,
                       w1x_ref, w1n_ref, b1_ref, w2_ref, b2_ref,
                       out_ref,                                # output row tile
                       agg_acc, xg_sc, ng_sc):                 # VMEM f32 scratch
    p = pl.program_id(0)
    t = pl.program_id(1)
    tile_rows = out_ref.shape[0]

    @pl.when(t == 0)
    def _():
        agg_acc[...] = jnp.zeros_like(agg_acc)
        # Hoisted edge_net: per-node partial dot products (bias folded into xg).
        xg_sc[...] = (jnp.sum(x_ref[...] * wex_ref[...], axis=-1, keepdims=True)
                      + be_ref[...])                       # (N_pad, 1)
        ng_sc[...] = jnp.sum(n_ref[...] * wen_ref[...], axis=-1, keepdims=True)

        num_edges = e_plane_ref.shape[1]    # static, padded to multiple of unroll

        def edge_block(blk, carry):
            base = blk * _EDGE_UNROLL
            for u in range(_EDGE_UNROLL):   # manual unroll
                e = base + u
                i = e_plane_ref[p, e]       # plane row (scatter target)
                j = e_nexus_ref[p, e]       # nexus row (gather source)
                gate = jax.nn.sigmoid(xg_sc[pl.ds(i, 1), :]
                                      + ng_sc[pl.ds(j, 1), :])     # (1, 1)
                agg_acc[pl.ds(i, 1), :] += gate * n_ref[pl.ds(j, 1), :]
            return carry

        lax.fori_loop(0, num_edges // _EDGE_UNROLL, edge_block, 0)

    # node update on this row tile (lane-dense 128-wide store)
    row0 = pl.multiple_of(t * tile_rows, _SUB)
    x_tile = x_ref[pl.ds(row0, tile_rows), :]                       # (TN, Fp_pad)
    agg_tile = agg_acc[pl.ds(row0, tile_rows), :] * dinv_ref[...]   # mean aggregation
    h = jnp.tanh(
        jnp.dot(x_tile.astype(jnp.bfloat16), w1x_ref[...],
                preferred_element_type=jnp.float32)
        + jnp.dot(agg_tile.astype(jnp.bfloat16), w1n_ref[...],
                  preferred_element_type=jnp.float32)
        + b1_ref[...]).astype(jnp.bfloat16)
    out_ref[...] = jnp.tanh(
        jnp.dot(h, w2_ref[...], preferred_element_type=jnp.float32)
        + b2_ref[...]).astype(out_ref.dtype)


# ---------------------------------------------------------------------------
# NexusNet forward (padding / stacking glue + two pallas_calls)
# ---------------------------------------------------------------------------
def nexusnet_forward(params, x, edge_index, nexus):
    """Returns (updated x dict, nexus embedding n)."""
    planes = list(x.keys())
    P = len(planes)
    M = int(nexus.shape[0])                 # nexus features only supply the node count
    Fp = int(next(iter(x.values())).shape[1])
    Fn = int(params["nexus_net"]["w2"].shape[0])

    f32, bf16 = jnp.float32, jnp.bfloat16

    Fp_pad = _round_up(Fp, _LANE)
    Fn_pad = _round_up(Fn, _LANE)
    M_pad = _round_up(M, _SUB)

    N_max = max(int(v.shape[0]) for v in x.values())
    # +1 guarantees an all-zero dummy row at index N_pad-1 for padded edges.
    if N_max + 1 <= 512:
        TN = _round_up(N_max + 1, _SUB)
    else:
        TN = 512
    N_pad = _round_up(N_max + 1, TN)
    NT = N_pad // TN
    E_max = max(int(edge_index[p].shape[1]) for p in planes)
    E_pad = _round_up(max(E_max, 1), _EDGE_UNROLL)

    # ---- stacked / padded operands -------------------------------------
    x_stack = _stack_planes([x[p] for p in planes], (P, N_pad, Fp_pad), f32)

    # padded edges: source/target plane row = dummy zero row, nexus row = 0
    e_plane = jnp.full((P, E_pad), N_pad - 1, jnp.int32)
    e_nexus = jnp.zeros((P, E_pad), jnp.int32)
    dinv = jnp.zeros((P, N_pad, 1), f32)
    for i, p in enumerate(planes):
        ei = edge_index[p].astype(jnp.int32)
        E = int(ei.shape[1])
        e_plane = e_plane.at[i, :E].set(ei[0])
        e_nexus = e_nexus.at[i, :E].set(ei[1])
        deg = jnp.zeros((N_pad,), f32).at[ei[0]].add(1.0)
        dinv = dinv.at[i, :, 0].set(
            jnp.where(deg > 0, 1.0 / jnp.maximum(deg, 1.0), 0.0))

    pn = params["nexus_net"]
    w1_stack = jnp.zeros((P, Fp_pad, Fn_pad), bf16)
    for i in range(P):
        w1_stack = w1_stack.at[i, :Fp, :Fn].set(
            pn["w1"][i * Fp:(i + 1) * Fp, :].astype(bf16))
    b1n = jnp.zeros((1, Fn_pad), f32).at[:, :Fn].set(pn["b1"])
    w2n = jnp.zeros((Fn_pad, Fn_pad), bf16).at[:Fn, :Fn].set(pn["w2"].astype(bf16))
    b2n = jnp.zeros((1, Fn_pad), f32).at[:, :Fn].set(pn["b2"])

    pdl = [params["nexus_down"][p] for p in planes]
    wex = _stack_planes([d["wex"] for d in pdl], (P, 1, Fp_pad), f32)
    wen = _stack_planes([d["wen"] for d in pdl], (P, 1, Fn_pad), f32)
    be = _stack_planes([d["be"] for d in pdl], (P, 1, 1), f32)
    w1x = _stack_planes([d["w1x"] for d in pdl], (P, Fp_pad, Fp_pad), bf16)
    w1n = _stack_planes([d["w1n"] for d in pdl], (P, Fn_pad, Fp_pad), bf16)
    b1d = _stack_planes([d["b1"] for d in pdl], (P, 1, Fp_pad), f32)
    w2d = _stack_planes([d["w2"] for d in pdl], (P, Fp_pad, Fp_pad), bf16)
    b2d = _stack_planes([d["b2"] for d in pdl], (P, 1, Fp_pad), f32)

    # ---- kernel A: nexus_up + nexus_net ---------------------------------
    n_full = pl.pallas_call(
        _nexus_up_net_kernel,
        out_shape=jax.ShapeDtypeStruct((M_pad, Fn_pad), f32),
        grid_spec=pltpu.PrefetchScalarGridSpec(
            num_scalar_prefetch=2,
            grid=(P,),
            in_specs=[
                pl.BlockSpec((None, N_pad, Fp_pad), lambda p, ep, en: (p, 0, 0)),
                pl.BlockSpec((None, Fp_pad, Fn_pad), lambda p, ep, en: (p, 0, 0)),
                pl.BlockSpec((1, Fn_pad), lambda p, ep, en: (0, 0)),
                pl.BlockSpec((Fn_pad, Fn_pad), lambda p, ep, en: (0, 0)),
                pl.BlockSpec((1, Fn_pad), lambda p, ep, en: (0, 0)),
            ],
            out_specs=pl.BlockSpec((M_pad, Fn_pad), lambda p, ep, en: (0, 0)),
            scratch_shapes=[
                pltpu.VMEM((M_pad, Fp_pad), f32),   # per-plane scatter-sum
                pltpu.VMEM((M_pad, Fn_pad), f32),   # first-linear accumulator
            ],
        ),
        compiler_params=pltpu.CompilerParams(
            dimension_semantics=("arbitrary",),
            vmem_limit_bytes=32 * 1024 * 1024,
        ),
    )(e_plane, e_nexus, x_stack, w1_stack, b1n, w2n, b2n)

    # ---- kernel C: NexusDown for all planes ------------------------------
    x_down = pl.pallas_call(
        _nexus_down_kernel,
        out_shape=jax.ShapeDtypeStruct((P, N_pad, Fp_pad), bf16),
        grid_spec=pltpu.PrefetchScalarGridSpec(
            num_scalar_prefetch=2,
            grid=(P, NT),
            in_specs=[
                pl.BlockSpec((None, N_pad, Fp_pad), lambda p, t, ep, en: (p, 0, 0)),
                pl.BlockSpec((M_pad, Fn_pad), lambda p, t, ep, en: (0, 0)),
                pl.BlockSpec((None, TN, 1), lambda p, t, ep, en: (p, t, 0)),
                pl.BlockSpec((None, 1, Fp_pad), lambda p, t, ep, en: (p, 0, 0)),
                pl.BlockSpec((None, 1, Fn_pad), lambda p, t, ep, en: (p, 0, 0)),
                pl.BlockSpec((None, 1, 1), lambda p, t, ep, en: (p, 0, 0)),
                pl.BlockSpec((None, Fp_pad, Fp_pad), lambda p, t, ep, en: (p, 0, 0)),
                pl.BlockSpec((None, Fn_pad, Fp_pad), lambda p, t, ep, en: (p, 0, 0)),
                pl.BlockSpec((None, 1, Fp_pad), lambda p, t, ep, en: (p, 0, 0)),
                pl.BlockSpec((None, Fp_pad, Fp_pad), lambda p, t, ep, en: (p, 0, 0)),
                pl.BlockSpec((None, 1, Fp_pad), lambda p, t, ep, en: (p, 0, 0)),
            ],
            out_specs=pl.BlockSpec((None, TN, Fp_pad), lambda p, t, ep, en: (p, t, 0)),
            scratch_shapes=[
                pltpu.VMEM((N_pad, Fn_pad), f32),   # gated-message scatter-sum
                pltpu.VMEM((N_pad, 1), f32),        # per-plane-node gate logit (+bias)
                pltpu.VMEM((M_pad, 1), f32),        # per-nexus-node gate logit
            ],
        ),
        compiler_params=pltpu.CompilerParams(
            dimension_semantics=("parallel", "arbitrary"),
            vmem_limit_bytes=32 * 1024 * 1024,
        ),
    )(e_plane, e_nexus, x_stack, n_full, dinv,
      wex, wen, be, w1x, w1n, b1d, w2d, b2d)

    # ---- crop padding ----------------------------------------------------
    n_out = n_full[:M, :Fn]
    x_out = {}
    for i, p in enumerate(planes):
        Np = int(x[p].shape[0])
        x_out[p] = x_down[i, :Np, :Fp].astype(f32)
    return x_out, n_out


# ---------------------------------------------------------------------------
# Pure-JAX reference (float32) for correctness checking
# ---------------------------------------------------------------------------
def nexusnet_reference(params, x, edge_index, nexus):
    planes = list(x.keys())
    M = int(nexus.shape[0])
    n_parts = []
    for p in planes:
        ei = edge_index[p]
        agg = jnp.zeros((M, x[p].shape[1]), jnp.float32).at[ei[1]].add(x[p][ei[0]])
        n_parts.append(agg)
    ncat = jnp.concatenate(n_parts, axis=-1)
    pn = params["nexus_net"]
    n = jnp.tanh(ncat @ pn["w1"] + pn["b1"])
    n = jnp.tanh(n @ pn["w2"] + pn["b2"])
    x_out = {}
    for p in planes:
        ei = edge_index[p]
        pd = params["nexus_down"][p]
        x_i = x[p][ei[0]]
        n_j = n[ei[1]]
        gate = jax.nn.sigmoid(
            jnp.sum(x_i * pd["wex"], axis=-1, keepdims=True)
            + jnp.sum(n_j * pd["wen"], axis=-1, keepdims=True) + pd["be"])
        msg = gate * n_j
        Np = x[p].shape[0]
        num = jnp.zeros((Np, n.shape[1]), jnp.float32).at[ei[0]].add(msg)
        deg = jnp.zeros((Np,), jnp.float32).at[ei[0]].add(1.0)
        agg = jnp.where(deg[:, None] > 0, num / jnp.maximum(deg, 1.0)[:, None], 0.0)
        h = jnp.tanh(x[p] @ pd["w1x"] + agg @ pd["w1n"] + pd["b1"])
        x_out[p] = jnp.tanh(h @ pd["w2"] + pd["b2"])
    return x_out, n


# ---------------------------------------------------------------------------
# Deterministic parameter construction
# ---------------------------------------------------------------------------
def make_params(key, planes, planar_features, nexus_features):
    def nrm(k, shape, scale=0.1):
        return scale * jax.random.normal(k, shape, jnp.float32)

    keys = iter(jax.random.split(key, 4 + 8 * len(planes)))
    params = {
        "nexus_net": {
            "w1": nrm(next(keys), (len(planes) * planar_features, nexus_features)),
            "b1": nrm(next(keys), (1, nexus_features)),
            "w2": nrm(next(keys), (nexus_features, nexus_features)),
            "b2": nrm(next(keys), (1, nexus_features)),
        },
        "nexus_down": {},
    }
    for p in planes:
        params["nexus_down"][p] = {
            "wex": nrm(next(keys), (1, planar_features)),   # edge_net weight (x part)
            "wen": nrm(next(keys), (1, nexus_features)),    # edge_net weight (n part)
            "be":  nrm(next(keys), (1, 1)),                 # edge_net bias
            "w1x": nrm(next(keys), (planar_features, planar_features)),
            "w1n": nrm(next(keys), (nexus_features, planar_features)),
            "b1":  nrm(next(keys), (1, planar_features)),
            "w2":  nrm(next(keys), (planar_features, planar_features)),
            "b2":  nrm(next(keys), (1, planar_features)),
        }
    return params


# ---------------------------------------------------------------------------
# Example run
# ---------------------------------------------------------------------------
if __name__ == "__main__":
    key = jax.random.PRNGKey(0)
    planes = ["u", "v", "y"]
    planar_features = 16
    nexus_features = 32
    num_nodes = {"u": 24, "v": 16, "y": 32}
    num_edges = {"u": 48, "v": 32, "y": 64}
    num_nexus = 8

    kp, kx, ke, kn = jax.random.split(key, 4)
    params = make_params(kp, planes, planar_features, nexus_features)

    x = {}
    edge_index = {}
    xkeys = jax.random.split(kx, len(planes))
    ekeys = jax.random.split(ke, len(planes))
    for i, p in enumerate(planes):
        x[p] = jax.random.normal(xkeys[i], (num_nodes[p], planar_features),
                                 jnp.float32)
        kpl, knx = jax.random.split(ekeys[i])
        plane_idx = jax.random.randint(kpl, (num_edges[p],), 0, num_nodes[p],
                                       dtype=jnp.int32)
        nexus_idx = jax.random.randint(knx, (num_edges[p],), 0, num_nexus,
                                       dtype=jnp.int32)
        edge_index[p] = jnp.stack([plane_idx, nexus_idx], axis=0)

    # nexus tensor only supplies the nexus-node count (SimpleConv bipartite target)
    nexus = jax.random.normal(kn, (num_nexus, nexus_features), jnp.float32)

    x_new, n_emb = nexusnet_forward(params, x, edge_index, nexus)
    jax.block_until_ready(n_emb)
    for p in planes:
        jax.block_until_ready(x_new[p])
        assert x_new[p].shape == (num_nodes[p], planar_features)
    assert n_emb.shape == (num_nexus, nexus_features)

    # correctness vs pure-JAX f32 reference (tolerance covers bf16 MXU operands)
    x_ref, n_ref = nexusnet_reference(params, x, edge_index, nexus)
    np.testing.assert_allclose(np.asarray(n_emb, np.float32),
                               np.asarray(n_ref, np.float32),
                               atol=1e-1, rtol=0)
    for p in planes:
        np.testing.assert_allclose(np.asarray(x_new[p], np.float32),
                                   np.asarray(x_ref[p], np.float32),
                                   atol=1e-1, rtol=0)

    print("KERNEL_OK")
</pallas_src>

<mosaic_0001>
module attributes {stable_mosaic.version = 11 : i64} {
  func.func @_nexus_up_net_kernel(%arg0: i32, %arg1: memref<3x64xi32, #tpu.memory_space<smem>>, %arg2: memref<3x64xi32, #tpu.memory_space<smem>>, %arg3: memref<1x40x128xf32, #tpu.memory_space<vmem>>, %arg4: memref<1x128x128xbf16, #tpu.memory_space<vmem>>, %arg5: memref<1x128xf32, #tpu.memory_space<vmem>>, %arg6: memref<128x128xbf16, #tpu.memory_space<vmem>>, %arg7: memref<1x128xf32, #tpu.memory_space<vmem>>, %arg8: memref<8x128xf32, #tpu.memory_space<vmem>>, %arg9: memref<8x128xf32, #tpu.memory_space<vmem>>, %arg10: memref<8x128xf32, #tpu.memory_space<vmem>>) attributes {dimension_semantics = [#tpu.dimension_semantics<arbitrary>], iteration_bounds = array<i64: 3>, scalar_prefetch = 2 : i64, scratch_operands = 2 : i64, tpu.core_type = #tpu.core_type<tc>, window_params = [{transform_indices = @transform_0, window_bounds = array<i64: 1, 40, 128>}, {transform_indices = @transform_1, window_bounds = array<i64: 1, 128, 128>}, {pipeline_mode = #tpu.pipeline_mode<synchronous>, transform_indices = @transform_2, window_bounds = array<i64: 1, 128>}, {pipeline_mode = #tpu.pipeline_mode<synchronous>, transform_indices = @transform_3, window_bounds = array<i64: 128, 128>}, {pipeline_mode = #tpu.pipeline_mode<synchronous>, transform_indices = @transform_4, window_bounds = array<i64: 1, 128>}, {pipeline_mode = #tpu.pipeline_mode<synchronous>, transform_indices = @transform_5, window_bounds = array<i64: 8, 128>}]} {
    %c0_i32 = arith.constant 0 : i32
    %0 = arith.cmpi eq, %arg0, %c0_i32 : i32
    %1 = arith.extui %0 : i1 to i32
    %c0_i32_0 = arith.constant 0 : i32
    %2 = arith.cmpi ne, %1, %c0_i32_0 : i32
    scf.if %2 {
      %cst_15 = arith.constant 0.000000e+00 : f32
      %17 = vector.broadcast %cst_15 : f32 to vector<8x128xf32>
      %c0_16 = arith.constant 0 : index
      %c0_17 = arith.constant 0 : index
      %18 = vector.load %arg10[%c0_16, %c0_17] : memref<8x128xf32, #tpu.memory_space<vmem>>, vector<8x128xf32>
      tpu.vector_store %arg10[%c0_16, %c0_17], %17 {strides = array<i32>} : memref<8x128xf32, #tpu.memory_space<vmem>>, vector<8x128xf32>,
    } else {
    }
    %cst = arith.constant 0.000000e+00 : f32
    %3 = vector.broadcast %cst : f32 to vector<8x128xf32>
    %c0 = arith.constant 0 : index
    %c0_1 = arith.constant 0 : index
    %4 = vector.load %arg9[%c0, %c0_1] : memref<8x128xf32, #tpu.memory_space<vmem>>, vector<8x128xf32>
    tpu.vector_store %arg9[%c0, %c0_1], %3 {strides = array<i32>} : memref<8x128xf32, #tpu.memory_space<vmem>>, vector<8x128xf32>,
    %c0_i32_2 = arith.constant 0 : i32
    %c8_i32 = arith.constant 8 : i32
    %5 = arith.addi %c0_i32_2, %c8_i32 : i32
    %c1_i32 = arith.constant 1 : i32
    scf.for %arg11 = %c0_i32_2 to %5 step %c1_i32  : i32 {
      %c8_i32_15 = arith.constant 8 : i32
      %17 = arith.muli %arg11, %c8_i32_15 : i32
      %c0_i32_16 = arith.constant 0 : i32
      %18 = arith.addi %17, %c0_i32_16 : i32
      %19 = arith.index_cast %arg0 : i32 to index
      %20 = arith.index_cast %18 : i32 to index
      %21 = memref.load %arg1[%19, %20] : memref<3x64xi32, #tpu.memory_space<smem>>
      %22 = arith.index_cast %arg0 : i32 to index
      %23 = arith.index_cast %18 : i32 to index
      %24 = memref.load %arg2[%22, %23] : memref<3x64xi32, #tpu.memory_space<smem>>
      %c0_17 = arith.constant 0 : index
      %25 = arith.index_cast %21 : i32 to index
      %c0_18 = arith.constant 0 : index
      %26 = vector.load %arg3[%c0_17, %25, %c0_18] : memref<1x40x128xf32, #tpu.memory_space<vmem>>, vector<1x1x128xf32>
      %27 = vector.shape_cast %26 : vector<1x1x128xf32> to vector<1x128xf32>
      %28 = arith.index_cast %24 : i32 to index
      %c0_19 = arith.constant 0 : index
      %29 = vector.load %arg9[%28, %c0_19] : memref<8x128xf32, #tpu.memory_space<vmem>>, vector<1x128xf32>
      %30 = arith.addf %29, %27 : vector<1x128xf32>
      %31 = arith.index_cast %24 : i32 to index
      %c0_20 = arith.constant 0 : index
      %32 = vector.load %arg9[%31, %c0_20] : memref<8x128xf32, #tpu.memory_space<vmem>>, vector<1x128xf32>
      tpu.vector_store %arg9[%31, %c0_20], %30 {strides = array<i32>} : memref<8x128xf32, #tpu.memory_space<vmem>>, vector<1x128xf32>,
      %c1_i32_21 = arith.constant 1 : i32
      %33 = arith.addi %17, %c1_i32_21 : i32
      %34 = arith.index_cast %arg0 : i32 to index
      %35 = arith.index_cast %33 : i32 to index
      %36 = memref.load %arg1[%34, %35] : memref<3x64xi32, #tpu.memory_space<smem>>
      %37 = arith.index_cast %arg0 : i32 to index
      %38 = arith.index_cast %33 : i32 to index
      %39 = memref.load %arg2[%37, %38] : memref<3x64xi32, #tpu.memory_space<smem>>
      %c0_22 = arith.constant 0 : index
      %40 = arith.index_cast %36 : i32 to index
      %c0_23 = arith.constant 0 : index
      %41 = vector.load %arg3[%c0_22, %40, %c0_23] : memref<1x40x128xf32, #tpu.memory_space<vmem>>, vector<1x1x128xf32>
      %42 = vector.shape_cast %41 : vector<1x1x128xf32> to vector<1x128xf32>
      %43 = arith.index_cast %39 : i32 to index
      %c0_24 = arith.constant 0 : index
      %44 = vector.load %arg9[%43, %c0_24] : memref<8x128xf32, #tpu.memory_space<vmem>>, vector<1x128xf32>
      %45 = arith.addf %44, %42 : vector<1x128xf32>
      %46 = arith.index_cast %39 : i32 to index
      %c0_25 = arith.constant 0 : index
      %47 = vector.load %arg9[%46, %c0_25] : memref<8x128xf32, #tpu.memory_space<vmem>>, vector<1x128xf32>
      tpu.vector_store %arg9[%46, %c0_25], %45 {strides = array<i32>} : memref<8x128xf32, #tpu.memory_space<vmem>>, vector<1x128xf32>,
      %c2_i32_26 = arith.constant 2 : i32
      %48 = arith.addi %17, %c2_i32_26 : i32
      %49 = arith.index_cast %arg0 : i32 to index
      %50 = arith.index_cast %48 : i32 to index
      %51 = memref.load %arg1[%49, %50] : memref<3x64xi32, #tpu.memory_space<smem>>
      %52 = arith.index_cast %arg0 : i32 to index
      %53 = arith.index_cast %48 : i32 to index
      %54 = memref.load %arg2[%52, %53] : memref<3x64xi32, #tpu.memory_space<smem>>
      %c0_27 = arith.constant 0 : index
      %55 = arith.index_cast %51 : i32 to index
      %c0_28 = arith.constant 0 : index
      %56 = vector.load %arg3[%c0_27, %55, %c0_28] : memref<1x40x128xf32, #tpu.memory_space<vmem>>, vector<1x1x128xf32>
      %57 = vector.shape_cast %56 : vector<1x1x128xf32> to vector<1x128xf32>
      %58 = arith.index_cast %54 : i32 to index
      %c0_29 = arith.constant 0 : index
      %59 = vector.load %arg9[%58, %c0_29] : memref<8x128xf32, #tpu.memory_space<vmem>>, vector<1x128xf32>
      %60 = arith.addf %59, %57 : vector<1x128xf32>
      %61 = arith.index_cast %54 : i32 to index
      %c0_30 = arith.constant 0 : index
      %62 = vector.load %arg9[%61, %c0_30] : memref<8x128xf32, #tpu.memory_space<vmem>>, vector<1x128xf32>
      tpu.vector_store %arg9[%61, %c0_30], %60 {strides = array<i32>} : memref<8x128xf32, #tpu.memory_space<vmem>>, vector<1x128xf32>,
      %c3_i32 = arith.constant 3 : i32
      %63 = arith.addi %17, %c3_i32 : i32
      %64 = arith.index_cast %arg0 : i32 to index
      %65 = arith.index_cast %63 : i32 to index
      %66 = memref.load %arg1[%64, %65] : memref<3x64xi32, #tpu.memory_space<smem>>
      %67 = arith.index_cast %arg0 : i32 to index
      %68 = arith.index_cast %63 : i32 to index
      %69 = memref.load %arg2[%67, %68] : memref<3x64xi32, #tpu.memory_space<smem>>
      %c0_31 = arith.constant 0 : index
      %70 = arith.index_cast %66 : i32 to index
      %c0_32 = arith.constant 0 : index
      %71 = vector.load %arg3[%c0_31, %70, %c0_32] : memref<1x40x128xf32, #tpu.memory_space<vmem>>, vector<1x1x128xf32>
      %72 = vector.shape_cast %71 : vector<1x1x128xf32> to vector<1x128xf32>
      %73 = arith.index_cast %69 : i32 to index
      %c0_33 = arith.constant 0 : index
      %74 = vector.load %arg9[%73, %c0_33] : memref<8x128xf32, #tpu.memory_space<vmem>>, vector<1x128xf32>
      %75 = arith.addf %74, %72 : vector<1x128xf32>
      %76 = arith.index_cast %69 : i32 to index
      %c0_34 = arith.constant 0 : index
      %77 = vector.load %arg9[%76, %c0_34] : memref<8x128xf32, #tpu.memory_space<vmem>>, vector<1x128xf32>
      tpu.vector_store %arg9[%76, %c0_34], %75 {strides = array<i32>} : memref<8x128xf32, #tpu.memory_space<vmem>>, vector<1x128xf32>,
      %c4_i32 = arith.constant 4 : i32
      %78 = arith.addi %17, %c4_i32 : i32
      %79 = arith.index_cast %arg0 : i32 to index
      %80 = arith.index_cast %78 : i32 to index
      %81 = memref.load %arg1[%79, %80] : memref<3x64xi32, #tpu.memory_space<smem>>
      %82 = arith.index_cast %arg0 : i32 to index
      %83 = arith.index_cast %78 : i32 to index
      %84 = memref.load %arg2[%82, %83] : memref<3x64xi32, #tpu.memory_space<smem>>
      %c0_35 = arith.constant 0 : index
      %85 = arith.index_cast %81 : i32 to index
      %c0_36 = arith.constant 0 : index
      %86 = vector.load %arg3[%c0_35, %85, %c0_36] : memref<1x40x128xf32, #tpu.memory_space<vmem>>, vector<1x1x128xf32>
      %87 = vector.shape_cast %86 : vector<1x1x128xf32> to vector<1x128xf32>
      %88 = arith.index_cast %84 : i32 to index
      %c0_37 = arith.constant 0 : index
      %89 = vector.load %arg9[%88, %c0_37] : memref<8x128xf32, #tpu.memory_space<vmem>>, vector<1x128xf32>
      %90 = arith.addf %89, %87 : vector<1x128xf32>
      %91 = arith.index_cast %84 : i32 to index
      %c0_38 = arith.constant 0 : index
      %92 = vector.load %arg9[%91, %c0_38] : memref<8x128xf32, #tpu.memory_space<vmem>>, vector<1x128xf32>
      tpu.vector_store %arg9[%91, %c0_38], %90 {strides = array<i32>} : memref<8x128xf32, #tpu.memory_space<vmem>>, vector<1x128xf32>,
      %c5_i32 = arith.constant 5 : i32
      %93 = arith.addi %17, %c5_i32 : i32
      %94 = arith.index_cast %arg0 : i32 to index
      %95 = arith.index_cast %93 : i32 to index
      %96 = memref.load %arg1[%94, %95] : memref<3x64xi32, #tpu.memory_space<smem>>
      %97 = arith.index_cast %arg0 : i32 to index
      %98 = arith.index_cast %93 : i32 to index
      %99 = memref.load %arg2[%97, %98] : memref<3x64xi32, #tpu.memory_space<smem>>
      %c0_39 = arith.constant 0 : index
      %100 = arith.index_cast %96 : i32 to index
      %c0_40 = arith.constant 0 : index
      %101 = vector.load %arg3[%c0_39, %100, %c0_40] : memref<1x40x128xf32, #tpu.memory_space<vmem>>, vector<1x1x128xf32>
      %102 = vector.shape_cast %101 : vector<1x1x128xf32> to vector<1x128xf32>
      %103 = arith.index_cast %99 : i32 to index
      %c0_41 = arith.constant 0 : index
      %104 = vector.load %arg9[%103, %c0_41] : memref<8x128xf32, #tpu.memory_space<vmem>>, vector<1x128xf32>
      %105 = arith.addf %104, %102 : vector<1x128xf32>
      %106 = arith.index_cast %99 : i32 to index
      %c0_42 = arith.constant 0 : index
      %107 = vector.load %arg9[%106, %c0_42] : memref<8x128xf32, #tpu.memory_space<vmem>>, vector<1x128xf32>
      tpu.vector_store %arg9[%106, %c0_42], %105 {strides = array<i32>} : memref<8x128xf32, #tpu.memory_space<vmem>>, vector<1x128xf32>,
      %c6_i32 = arith.constant 6 : i32
      %108 = arith.addi %17, %c6_i32 : i32
      %109 = arith.index_cast %arg0 : i32 to index
      %110 = arith.index_cast %108 : i32 to index
      %111 = memref.load %arg1[%109, %110] : memref<3x64xi32, #tpu.memory_space<smem>>
      %112 = arith.index_cast %arg0 : i32 to index
      %113 = arith.index_cast %108 : i32 to index
      %114 = memref.load %arg2[%112, %113] : memref<3x64xi32, #tpu.memory_space<smem>>
      %c0_43 = arith.constant 0 : index
      %115 = arith.index_cast %111 : i32 to index
      %c0_44 = arith.constant 0 : index
      %116 = vector.load %arg3[%c0_43, %115, %c0_44] : memref<1x40x128xf32, #tpu.memory_space<vmem>>, vector<1x1x128xf32>
      %117 = vector.shape_cast %116 : vector<1x1x128xf32> to vector<1x128xf32>
      %118 = arith.index_cast %114 : i32 to index
      %c0_45 = arith.constant 0 : index
      %119 = vector.load %arg9[%118, %c0_45] : memref<8x128xf32, #tpu.memory_space<vmem>>, vector<1x128xf32>
      %120 = arith.addf %119, %117 : vector<1x128xf32>
      %121 = arith.index_cast %114 : i32 to index
      %c0_46 = arith.constant 0 : index
      %122 = vector.load %arg9[%121, %c0_46] : memref<8x128xf32, #tpu.memory_space<vmem>>, vector<1x128xf32>
      tpu.vector_store %arg9[%121, %c0_46], %120 {strides = array<i32>} : memref<8x128xf32, #tpu.memory_space<vmem>>, vector<1x128xf32>,
      %c7_i32 = arith.constant 7 : i32
      %123 = arith.addi %17, %c7_i32 : i32
      %124 = arith.index_cast %arg0 : i32 to index
      %125 = arith.index_cast %123 : i32 to index
      %126 = memref.load %arg1[%124, %125] : memref<3x64xi32, #tpu.memory_space<smem>>
      %127 = arith.index_cast %arg0 : i32 to index
      %128 = arith.index_cast %123 : i32 to index
      %129 = memref.load %arg2[%127, %128] : memref<3x64xi32, #tpu.memory_space<smem>>
      %c0_47 = arith.constant 0 : index
      %130 = arith.index_cast %126 : i32 to index
      %c0_48 = arith.constant 0 : index
      %131 = vector.load %arg3[%c0_47, %130, %c0_48] : memref<1x40x128xf32, #tpu.memory_space<vmem>>, vector<1x1x128xf32>
      %132 = vector.shape_cast %131 : vector<1x1x128xf32> to vector<1x128xf32>
      %133 = arith.index_cast %129 : i32 to index
      %c0_49 = arith.constant 0 : index
      %134 = vector.load %arg9[%133, %c0_49] : memref<8x128xf32, #tpu.memory_space<vmem>>, vector<1x128xf32>
      %135 = arith.addf %134, %132 : vector<1x128xf32>
      %136 = arith.index_cast %129 : i32 to index
      %c0_50 = arith.constant 0 : index
      %137 = vector.load %arg9[%136, %c0_50] : memref<8x128xf32, #tpu.memory_space<vmem>>, vector<1x128xf32>
      tpu.vector_store %arg9[%136, %c0_50], %135 {strides = array<i32>} : memref<8x128xf32, #tpu.memory_space<vmem>>, vector<1x128xf32>,
    }
    %c8_i32_3 = arith.constant 8 : i32
    %c0_4 = arith.constant 0 : index
    %c0_5 = arith.constant 0 : index
    %6 = vector.load %arg10[%c0_4, %c0_5] : memref<8x128xf32, #tpu.memory_space<vmem>>, vector<8x128xf32>
    %c0_6 = arith.constant 0 : index
    %c0_7 = arith.constant 0 : index
    %7 = vector.load %arg9[%c0_6, %c0_7] : memref<8x128xf32, #tpu.memory_space<vmem>>, vector<8x128xf32>
    %8 = arith.truncf %7 : vector<8x128xf32> to vector<8x128xbf16>
    %c0_8 = arith.constant 0 : index
    %c0_9 = arith.constant 0 : index
    %c0_10 = arith.constant 0 : index
    %9 = vector.load %arg4[%c0_8, %c0_9, %c0_10] : memref<1x128x128xbf16, #tpu.memory_space<vmem>>, vector<1x128x128xbf16>
    %10 = vector.shape_cast %9 : vector<1x128x128xbf16> to vector<128x128xbf16>
    %cst_11 = arith.constant dense<0.000000e+00> : vector<8x128xf32>
    %11 = tpu.matmul %8, %10, %cst_11 {dimension_numbers = #tpu.dot_dimension_numbers<[1], [0], [0], [1], [0, 0, 1, 1], [], []>} : vector<8x128xbf16>, vector<128x128xbf16>, vector<8x128xf32> -> vector<8x128xf32>
    %12 = arith.addf %6, %11 : vector<8x128xf32>
    %c0_12 = arith.constant 0 : index
    %c0_13 = arith.constant 0 : index
    %13 = vector.load %arg10[%c0_12, %c0_13] : memref<8x128xf32, #tpu.memory_space<vmem>>, vector<8x128xf32>
    tpu.vector_store %arg10[%c0_12, %c0_13], %12 {strides = array<i32>} : memref<8x128xf32, #tpu.memory_space<vmem>>, vector<8x128xf32>,
    %c2_i32 = arith.constant 2 : i32
    %14 = arith.cmpi eq, %arg0, %c2_i32 : i32
    %15 = arith.extui %14 : i1 to i32
    %c0_i32_14 = arith.constant 0 : i32
    %16 = arith.cmpi ne, %15, %c0_i32_14 : i32
    scf.if %16 {
      %c0_15 = arith.constant 0 : index
      %c0_16 = arith.constant 0 : index
      %17 = vector.load %arg10[%c0_15, %c0_16] : memref<8x128xf32, #tpu.memory_space<vmem>>, vector<8x128xf32>
      %c0_17 = arith.constant 0 : index
      %c0_18 = arith.constant 0 : index
      %18 = vector.load %arg5[%c0_17, %c0_18] : memref<1x128xf32, #tpu.memory_space<vmem>>, vector<1x128xf32>
      %19 = vector.broadcast %18 : vector<1x128xf32> to vector<8x128xf32>
      %20 = arith.addf %17, %19 : vector<8x128xf32>
      %21 = math.tanh %20 : vector<8x128xf32>
      %22 = arith.truncf %21 : vector<8x128xf32> to vector<8x128xbf16>
      %c0_19 = arith.constant 0 : index
      %c0_20 = arith.constant 0 : index
      %23 = vector.load %arg6[%c0_19, %c0_20] : memref<128x128xbf16, #tpu.memory_space<vmem>>, vector<128x128xbf16>
      %cst_21 = arith.constant dense<0.000000e+00> : vector<8x128xf32>
      %24 = tpu.matmul %22, %23, %cst_21 {dimension_numbers = #tpu.dot_dimension_numbers<[1], [0], [0], [1], [0, 0, 1, 1], [], []>} : vector<8x128xbf16>, vector<128x128xbf16>, vector<8x128xf32> -> vector<8x128xf32>
      %c0_22 = arith.constant 0 : index
      %c0_23 = arith.constant 0 : index
      %25 = vector.load %arg7[%c0_22, %c0_23] : memref<1x128xf32, #tpu.memory_space<vmem>>, vector<1x128xf32>
      %26 = vector.broadcast %25 : vector<1x128xf32> to vector<8x128xf32>
      %27 = arith.addf %24, %26 : vector<8x128xf32>
      %28 = math.tanh %27 : vector<8x128xf32>
      %c0_24 = arith.constant 0 : index
      %c0_25 = arith.constant 0 : index
      %29 = vector.load %arg8[%c0_24, %c0_25] : memref<8x128xf32, #tpu.memory_space<vmem>>, vector<8x128xf32>
      tpu.vector_store %arg8[%c0_24, %c0_25], %28 {strides = array<i32>} : memref<8x128xf32, #tpu.memory_space<vmem>>, vector<8x128xf32>,
    } else {
    }
    return
  }
  func.func @transform_0(%arg0: i32, %arg1: memref<3x64xi32, #tpu.memory_space<smem>>, %arg2: memref<3x64xi32, #tpu.memory_space<smem>>) -> (i32, i32, i32) {
    %c0_i32 = arith.constant 0 : i32
    %c0_i32_0 = arith.constant 0 : i32
    %c0_i32_1 = arith.constant 0 : i32
    return %arg0, %c0_i32, %c0_i32_0 : i32, i32, i32
  }
  func.func @transform_1(%arg0: i32, %arg1: memref<3x64xi32, #tpu.memory_space<smem>>, %arg2: memref<3x64xi32, #tpu.memory_space<smem>>) -> (i32, i32, i32) {
    %c0_i32 = arith.constant 0 : i32
    %c0_i32_0 = arith.constant 0 : i32
    %c0_i32_1 = arith.constant 0 : i32
    return %arg0, %c0_i32, %c0_i32_0 : i32, i32, i32
  }
  func.func @transform_2(%arg0: i32, %arg1: memref<3x64xi32, #tpu.memory_space<smem>>, %arg2: memref<3x64xi32, #tpu.memory_space<smem>>) -> (i32, i32) {
    %c0_i32 = arith.constant 0 : i32
    %c0_i32_0 = arith.constant 0 : i32
    %c0_i32_1 = arith.constant 0 : i32
    return %c0_i32, %c0_i32_0 : i32, i32
  }
  func.func @transform_3(%arg0: i32, %arg1: memref<3x64xi32, #tpu.memory_space<smem>>, %arg2: memref<3x64xi32, #tpu.memory_space<smem>>) -> (i32, i32) {
    %c0_i32 = arith.constant 0 : i32
    %c0_i32_0 = arith.constant 0 : i32
    %c0_i32_1 = arith.constant 0 : i32
    return %c0_i32, %c0_i32_0 : i32, i32
  }
  func.func @transform_4(%arg0: i32, %arg1: memref<3x64xi32, #tpu.memory_space<smem>>, %arg2: memref<3x64xi32, #tpu.memory_space<smem>>) -> (i32, i32) {
    %c0_i32 = arith.constant 0 : i32
    %c0_i32_0 = arith.constant 0 : i32
    %c0_i32_1 = arith.constant 0 : i32
    return %c0_i32, %c0_i32_0 : i32, i32
  }
  func.func @transform_5(%arg0: i32, %arg1: memref<3x64xi32, #tpu.memory_space<smem>>, %arg2: memref<3x64xi32, #tpu.memory_space<smem>>) -> (i32, i32) {
    %c0_i32 = arith.constant 0 : i32
    %c0_i32_0 = arith.constant 0 : i32
    %c0_i32_1 = arith.constant 0 : i32
    return %c0_i32, %c0_i32_0 : i32, i32
  }
}

</mosaic_0001>

<bundles_post_ra>
// kernel: tpu_custom_call.1
= control target key start
LH: loop header
LB: loop body
LE: loop exit
PB: predicated region body
PF: predicated region fallthrough
CT: control target
= control target key end

     0   :  { %s1539_s0 = inlined_call_operand.hbm [shape: s32[3,64], index: 0, kind: input, shape index: {}]   ;;  %s1540_s2 = inlined_call_operand.hbm [shape: f32[3,40,128], index: 2, kind: input, shape index: {}]   ;;  %s1541_s3 = inlined_call_operand.hbm [shape: bf16[3,128,128], index: 3, kind: input, shape index: {}]   ;;  %s1542_s4 = inlined_call_operand.vmem [shape: f32[1,128], index: 4, kind: input, shape index: {}]   ;;  %s1543_s5 = inlined_call_operand.hbm [shape: bf16[128,128], index: 5, kind: input, shape index: {}]   ;;  %s1544_s6 = inlined_call_operand.vmem [shape: f32[1,128], index: 6, kind: input, shape index: {}]   ;;  %s1545_s7 = inlined_call_operand.hbm [shape: f32[8,128], index: 7, kind: output, shape index: {}]   ;;  %s1546_s1 = inlined_call_operand.hbm [shape: s32[3,64], index: 1, kind: input, shape index: {}]  }
   0x1   :  { %1552 = sst [smem:[#allocation19_spill]] %s1540_s2  ;;  %s988_s26 = scalar_lea.hbm %s1539_s0, 64 }
   0x2   :  { %1553 = sst [smem:[#allocation20_spill]] %s1541_s3  ;;  %p989_p0 = scmp.ne.s32.totalorder %s1539_s0, %s988_s26 }
   0x3   :  { %1554 = sst [smem:[#allocation21_spill]] %s1543_s5  ;;  %p992_p1 = scmp.lt.u32.totalorder %s988_s26, %s1539_s0 }
   0x5   :  { %p994_p2 = pnand %p992_p1, %p989_p0 }
   0x7   :  { %997 = shalt.err (!%p994_p2)  }
   0x8   :  { %s1180_s8 = smov [#allocation5]   ;;  %s998_s13 = scalar_lea.hbm %s1546_s1, 64 }
   0x9   :  { %13 = dma.hbm_to_smem %s1539_s0, 64, %s1180_s8, [#allocation4] }
   0xa   :  { %p999_p3 = scmp.ne.s32.totalorder %s1546_s1, %s998_s13  ;;  %p1002_p4 = scmp.lt.u32.totalorder %s998_s13, %s1546_s1 }
   0xc   :  { %p1004_p5 = pnand %p1002_p4, %p999_p3 }
   0xe   :  { %1007 = shalt.err (!%p1004_p5)  }
   0xf   :  { %s1181_s18 = smov [#allocation6]  }
  0x10   :  { %15 = dma.hbm_to_smem %s1546_s1, 64, %s1181_s18, [#allocation4] }
  0x11   :  { %1142 = dma.done.wait [#allocation4], 128 }
  0x12   :  { %1143 = vsyncadd [#allocation4], 4294967168 }
  0x13   :  { %17 = sfence }
  0x14   :  { %18 = vsyncpa [#allocation8], 0 }
  0x15   :  { %20 = vsyncpa [#allocation8 + $0x1], 0 }
  0x16   :  { %21 = vsyncpa [#allocation11], 0 }
  0x17   :  { %23 = vsyncpa [#allocation11 + $0x1], 0 }
  0x18   :  { %24 = vsyncpa [#allocation9], 0  ;;  %s1259_s0 = smov 0   ;;  %s1261_s21 = smov 0  }
  0x19   :  { %s1263_s22 = smov 0   ;;  %s1265_s23 = smov 0  }
  0x1a LB: > { %s1278_s1 = sadd.s32 4294967295, %s1174_s23   ;;  %p50_p6 = scmp.ne.s32.totalorder %s1166_s21, %s1162_s0  ;;  %s1174_s23 = sphi %s1265_s23, %s1573_s23   ;;  %s1170_s22 = sphi %s1263_s22, %s1572_s22   ;;  %s1166_s21 = sphi %s1261_s21, %s1571_s21   ;;  %s1162_s0 = sphi %s1259_s0, %s1570_s0  }
  0x1b   : > { %p1547_p7 = scmp.eq.s32.totalorder %s1278_s1, 0  ;;  %p782_p8 = scmp.ge.s32.totalorder %s1174_s23, 1 }
  0x1c   : > { %p171_p9 = scmp.lt.s32.totalorder %s1174_s23, 4  ;;  %s1182_s26 = smov [#allocation12]  }
  0x1d   : > { %p1287_p11 = por %p1547_p7, %p50_p6  ;;  %s186_s27 = sshll.u32 %s1182_s26, 4  ;;  %s187_s27 = int_to_ptr.vmem [resolvable:$true] %s186_s27 }
  0x1e   : > { %p1291_p12 = pnand %p782_p8, %p171_p9  ;;  %s1304_s29 = sadd.s32 1, %s1174_s23  }
  0x1f   : > { %s1555_s24 = scalar_select %p1287_p11, 1, 0 }
  0x20   : > { %s1556_s25 = scalar_select %p1291_p12, 1, 0 }
  0x21   : > { %p899_p13 = pneg %p1291_p12  ;;  %s37_s30 = sadd.s32 1, %s1170_s22 }
  0x22   : > { %s34_s8 = ssub.s32 %s1174_s23, %s1304_s29  ;;  %s1558_s5 = sld [smem:[#allocation21_spill]] }
  0x23   : > { %p1299_p0 = pnand %p899_p13, %p1547_p7 }
  0x25   : > { %p1010_p2 = pneg %p1299_p0 }
  0x28   : > { %s1008_s11 = scalar_lea.hbm %s1558_s5, 1024 }
  0x29   : > { %p1009_p1 = scmp.ne.s32.totalorder %s1558_s5, %s1008_s11  ;;  %p1015_p5 = scmp.lt.u32.totalorder %s1008_s11, %s1558_s5 }
  0x2b   : > { %p1011_p3 = pnand %p1010_p2, %p1009_p1 }
  0x2d   : > { %p1012_p4 = pneg %p1011_p3 }
  0x2f   : > { %p1017_p6 = pnand %p1015_p5, %p1012_p4 }
  0x31   : > { %1020 = shalt.err (!%p1017_p6)
}
  0x32   : > { %s1021_s16 = scalar_lea.vmem %s187_s27, 1024  ;;  %p1029_p10 = scmp.lt.s32.totalorder %s187_s27, %s187_s27 }
  0x33   : > { %p1022_p8 = scmp.ne.s32.totalorder %s187_s27, %s1021_s16  ;;  %p1030_p7 = scmp.lt.s32.totalorder %s1021_s16, %s1021_s16 }
  0x35   : > { %p1024_p9 = pnand %p1022_p8, %p1010_p2  ;;  %p1031_p11 = por %p1030_p7, %p1029_p10 }
  0x37   : > { %p1025_p13 = pneg %p1024_p9 }
  0x39   : > { %p1032_p12 = pnand %p1031_p11, %p1025_p13 }
  0x3b   : > { %1035 = shalt.err (!%p1032_p12)
}
  0x3c   : > { %s1550_s17 = smov 64   ;;  %s1551_s18 = smov 4  }
  0x3d   : > { %902 = dma.hbm_to_vmem [thread:$0]  (!%p1299_p0), %s1558_s5, 1024, %s187_s27, [#allocation11], %s1550_s17, %s1550_s17, %s1551_s18  }
  0x3e   : > { %p35_p7 = scmp.eq.s32.totalorder %s34_s8, 0  ;;  %p44_p10 = scmp.ne.s32.totalorder %s1170_s22, %s1166_s21 }
  0x3f   : > { %p45_p11 = scmp.eq.s32.totalorder %s1174_s23, 0  ;;  %p911_p12 = scmp.lt.s32.totalorder %s1174_s23, 3 }
  0x40   : > { %s1333_s0 = scalar_select %p35_p7, %s1170_s22, %s37_s30  }
  0x41   : > { %p46_p1 = por %p45_p11, %p44_p10  ;;  %s1336_s26 = sand.u32 1, %s1170_s22  }
  0x42   : > { %s884_s28 = smul.u32 40, %s1336_s26  ;;  %s1560_s2 = sld [smem:[#allocation19_spill]] }
  0x43   : > { %s885_s9 = smul.u32 640, %s1174_s23  ;;  %p1340_p2 = pnand %p911_p12, %p46_p1 }
  0x44   : > { %s207_s30 = scalar_lea.vmem [#allocation7], %s884_s28  ;;  %s224_s13 = sand.u32 1, %s1174_s23  }
  0x45   : > { %s214_s8 = sshll.u32 %s207_s30, 4  ;;  %s204_s14 = scalar_lea.sflag [#allocation8], %s1336_s26  ;;  %s1349_s8 = int_to_ptr.vmem [resolvable:$true] %s214_s8 }
  0x46   : > { %p1038_p3 = pneg %p1340_p2 }
  0x48   : > { %s1347_s27 = scalar_lea.hbm %s1560_s2, %s885_s9  ;;  %s1041_s20 = scalar_lea.hbm %s1560_s2, 1920 }
  0x49   : > { %s1036_s15 = scalar_lea.hbm %s1347_s27, 640  ;;  %p1042_p6 = scmp.lt.u32.totalorder %s1347_s27, %s1560_s2 }
  0x4a   : > { %p1037_p0 = scmp.ne.s32.totalorder %s1347_s27, %s1036_s15  ;;  %p1043_p8 = scmp.lt.u32.totalorder %s1041_s20, %s1036_s15 }
  0x4b   : > { %p1045_p13 = scmp.lt.u32.totalorder %s1036_s15, %s1347_s27 }
  0x4c   : > { %p1039_p4 = pnand %p1038_p3, %p1037_p0  ;;  %p1044_p9 = por %p1043_p8, %p1042_p6 }
  0x4e   : > { %p1040_p5 = pneg %p1039_p4  ;;  %p1046_p7 = por %p1045_p13, %p1044_p9 }
  0x50   : > { %p1047_p10 = pnand %p1046_p7, %p1040_p5 }
  0x52   : > { %1050 = shalt.err (!%p1047_p10)
}
  0x53   : > { %s1051_s28 = scalar_lea.vmem %s1349_s8, 640  ;;  %s1185_s12 = smov [#allocation7]  }
  0x54   : > { %p1052_p11 = scmp.ne.s32.totalorder %s1349_s8, %s1051_s28  ;;  %s1056_s30 = sshll.u32 %s1185_s12, 4  ;;  %s1057_s30 = int_to_ptr.vmem [resolvable:$false] %s1056_s30 }
  0x55   : > { %s1058_s16 = scalar_lea.vmem %s1057_s30, 1280  ;;  %p1059_p0 = scmp.lt.s32.totalorder %s1349_s8, %s1057_s30 }
  0x56   : > { %p1054_p12 = pnand %p1052_p11, %p1038_p3  ;;  %p1060_p4 = scmp.lt.s32.totalorder %s1058_s16, %s1051_s28 }
  0x58   : > { %p1055_p1 = pneg %p1054_p12  ;;  %p1061_p6 = por %p1060_p4, %p1059_p0 }
  0x5a   : > { %p1062_p8 = pnand %p1061_p6, %p1055_p1 }
  0x5c   : > { %1065 = shalt.err (!%p1062_p8)
}
  0x5d   : > { %s1186_s15 = smov 128   ;;  %s1187_s19 = smov 8  }
  0x5e   : > { %906 = dma.hbm_to_vmem [thread:$0]  (!%p1340_p2), %s1347_s27, 640, %s1349_s8, %s204_s14, %s1186_s15, %s1186_s15, %s1187_s19  }
  0x5f   : > { %s786_s20 = sshll.u32 %s1336_s26, 6  ;;  %s825_s9 = sshll.u32 %s1174_s23, 10 }
  0x60   : > { %s1561_s3 = sld [smem:[#allocation20_spill]]  ;;  %s228_s30 = scalar_lea.vmem [#allocation10], %s786_s20 }
  0x61   : > { %s235_s16 = sshll.u32 %s228_s30, 4  ;;  %s1391_s17 = scalar_lea.sflag [#allocation11], %s224_s13  ;;  %s1387_s16 = int_to_ptr.vmem [resolvable:$true] %s235_s16 }
  0x66   : > { %s1385_s12 = scalar_lea.hbm %s1561_s3, %s825_s9  ;;  %s1071_s8 = scalar_lea.hbm %s1561_s3, 3072 }
  0x67   : > { %s1066_s18 = scalar_lea.hbm %s1385_s12, 1024  ;;  %p1072_p7 = scmp.lt.u32.totalorder %s1385_s12, %s1561_s3 }
  0x68   : > { %p1067_p5 = scmp.ne.s32.totalorder %s1385_s12, %s1066_s18  ;;  %p1073_p10 = scmp.lt.u32.totalorder %s1071_s8, %s1066_s18 }
  0x69   : > { %p1075_p12 = scmp.lt.u32.totalorder %s1066_s18, %s1385_s12 }
  0x6a   : > { %p1069_p9 = pnand %p1067_p5, %p1038_p3  ;;  %p1074_p11 = por %p1073_p10, %p1072_p7 }
  0x6c   : > { %p1070_p13 = pneg %p1069_p9  ;;  %p1076_p1 = por %p1075_p12, %p1074_p11 }
  0x6e   : > { %p1077_p0 = pnand %p1076_p1, %p1070_p13 }
  0x70   : > { %1080 = shalt.err (!%p1077_p0)
}
  0x71   : > { %s1081_s23 = scalar_lea.vmem %s1387_s16, 1024  ;;  %s1188_s13 = smov [#allocation10]  }
  0x72   : > { %p1082_p4 = scmp.ne.s32.totalorder %s1387_s16, %s1081_s23  ;;  %s1086_s19 = sshll.u32 %s1188_s13, 4  ;;  %s1087_s19 = int_to_ptr.vmem [resolvable:$false] %s1086_s19 }
  0x73   : > { %s1088_s20 = scalar_lea.vmem %s1087_s19, 2048  ;;  %p1089_p5 = scmp.lt.s32.totalorder %s1387_s16, %s1087_s19 }
  0x74   : > { %p1084_p6 = pnand %p1082_p4, %p1038_p3  ;;  %p1090_p9 = scmp.lt.s32.totalorder %s1088_s20, %s1081_s23 }
  0x76   : > { %p1085_p8 = pneg %p1084_p6  ;;  %p1091_p7 = por %p1090_p9, %p1089_p5 }
  0x78   : > { %p1092_p10 = pnand %p1091_p7, %p1085_p8 }
  0x7a   : > { %1095 = shalt.err (!%p1092_p10)
}
  0x7b   : > { %s1562_s18 = smov 4   ;;  %s1563_s9 = smov 64  }
  0x7c   : > { %909 = dma.hbm_to_vmem [thread:$0]  (!%p1340_p2), %s1385_s12, 1024, %s1387_s16, %s1391_s17, %s1563_s9, %s1563_s9, %s1562_s18  }
  0x7d   : > { %p1564_p3 = scmp.ne.s32.totalorder %s1556_s25, 0 }
  0x7e   : > { %s249_s11 = sand.u32 (!%p1564_p3), 1, %s1166_s21   ;;  %p1565_p13 = scmp.ne.s32.totalorder (!%p1564_p3), %s1555_s24, 0 }
  0x7f   : > { %247 = sbr.rel (%p1564_p3) target bundleno = 736 (0x2e0), region = 40  ;;  %s250_s30 = scalar_lea.sflag (!%p1564_p3), [#allocation8], %s249_s11 }
  0x80   : > { %s886_s28 = smul.u32 (!%p1564_p3), 40, %s249_s11 }
  0x82   : > { %s1423_s26 = scalar_lea.vmem (!%p1564_p3), [#allocation7], %s886_s28 }
  0x86   : > { %1145 = dma.done.wait (%p1565_p13), %s250_s30, 640  }
  0x87   : > { %1147 = vsyncadd (%p1565_p13), %s250_s30, 4294966656  ;;  %s258_s10 = sand.u32 1, %s1278_s1   ;;  %s790_s27 = sshll.u32 %s249_s11, 6 }
  0x88   : > { %s259_s17 = scalar_lea.sflag [#allocation11], %s258_s10  ;;  %s1430_s12 = scalar_lea.vmem [#allocation10], %s790_s27 }
  0x89   : > { %1149 = dma.done.wait (%p1565_p13), %s259_s17, 1024  }
  0x8a   : > { %1151 = vsyncadd (%p1565_p13), %s259_s17, 4294966272  ;;  %p1566_p2 = scmp.eq.s32.totalorder %s1278_s1, 0 }
  0x8c   : > { %1153 = dma.done.wait (%p1566_p2), [#allocation11], 1024   ;;  %p1567_p11 = pmov %p1566_p2 }
  0x8d   : > { %p1568_p12 = scmp.ne.s32.totalorder %s1278_s1, 0 }
  0x8e   : > { %1155 = vsyncadd (%p1567_p11), [#allocation11], 4294966272  ;;  %v1189_v0 = vmov (!%p1568_p12), 0.0  }
  0x8f   : > { %297 = sbr.rel (%p1568_p12) target bundleno = 150 (0x96), region = 56  ;;  %298 = vst [vmem:[#allocation3] sm:$0xff] (!%p1568_p12), %v1189_v0 }
  0x96 PF: > { %v1190_v1 = vmov 0.0   ;;  %s1443_s25 = smov 0  }
  0x97   : > { %299 = vst [vmem:[#allocation2] sm:$0xff] %v1190_v1 }
  0x98 LB: >> { %s1449_s24 = sshll.u32 %s1178_s25, 3  ;;  %s305_s25 = sadd.s32 1, %s1178_s25   ;;  %s1178_s25 = sphi %s1443_s25, %s305_s25  }
  0x99   : >> { %s307_s16 = sshra.s32 %s1449_s24, 7  ;;  %s312_s8 = sand.u32 127, %s1449_s24 }
  0x9a   : >> { %s309_s14 = sadd.s32 %s1278_s1, %s307_s16  ;;  %s322_s15 = sadd.s32 1, %s1449_s24 }
  0x9b   : >> { %s794_s23 = sshll.u32 %s309_s14, 7  ;;  %s323_s13 = sshra.s32 %s322_s15, 7 }
  0x9c   : >> { %s313_s19 = sadd.s32 %s794_s23, %s312_s8  ;;  %s325_s20 = sadd.s32 %s1278_s1, %s323_s13 }
  0x9d   : >> { %s314_s18 = sld [smem:[#allocation5 + %s313_s19]]  ;;  %s795_s11 = sshll.u32 %s325_s20, 7 }
  0x9e   : >> { %s315_s9 = sld [smem:[#allocation6 + %s313_s19]]  ;;  %s328_s28 = sand.u32 127, %s322_s15 }
  0x9f   : >> { %s329_s30 = sadd.s32 %s795_s11, %s328_s28  ;;  %s338_s10 = sadd.s32 2, %s1449_s24 }
  0xa0   : >> { %s330_s27 = sld [smem:[#allocation5 + %s329_s30]]  ;;  %s339_s17 = sshra.s32 %s338_s10, 7 }
  0xa1   : >> { %s331_s2 = sld [smem:[#allocation6 + %s329_s30]]  ;;  %s341_s3 = sadd.s32 %s1278_s1, %s339_s17 }
  0xa2   : >> { %s796_s8 = sshll.u32 %s341_s3, 7  ;;  %s344_s14 = sand.u32 127, %s338_s10 }
  0xa3   : >> { %s316_s16 = scalar_lea.vmem %s1423_s26, %s314_s18 [#allocation7]  ;;  %s354_s23 = sadd.s32 3, %s1449_s24 }
  0xa4   : >> { %v317_v2 = vld [vmem:[%s316_s16] sm:$0x1]  ;;  %s318_s5 = scalar_lea.vmem [#allocation2], %s315_s9  ;;  %s345_s15 = sadd.s32 %s796_s8, %s344_s14 }
  0xa5   : >> { %v319_v3 = vld [vmem:[%s318_s5] sm:$0x1]  ;;  %s355_s19 = sshra.s32 %s354_s23, 7  ;;  %s346_s20 = sld [smem:[#allocation5 + %s345_s15]] }
  0xa6   : >> { %v320_v4 = vadd.f32 %v319_v3, %v317_v2  ;;  %s332_s13 = scalar_lea.vmem %s1423_s26, %s330_s27 [#allocation7]  ;;  %s357_s11 = sadd.s32 %s1278_s1, %s355_s19 }
  0xa7   : >> { %v333_v5 = vld [vmem:[%s332_s13] sm:$0x1]  ;;  %s347_s28 = sld [smem:[#allocation6 + %s345_s15]]  ;;  %s334_s30 = scalar_lea.vmem [#allocation2], %s331_s2 }
  0xa8   : >> { %321 = vst [vmem:[%s318_s5] sm:$0x1] %v320_v4  ;;  %s797_s18 = sshll.u32 %s357_s11, 7  ;;  %s360_s9 = sand.u32 127, %s354_s23 }
  0xa9   : >> { %s370_s3 = sadd.s32 4, %s1449_s24  ;;  %s361_s10 = sadd.s32 %s797_s18, %s360_s9 }
  0xaa   : >> { %s371_s17 = sshra.s32 %s370_s3, 7  ;;  %s362_s16 = sld [smem:[#allocation5 + %s361_s10]] }
  0xab   : >> { %s348_s5 = scalar_lea.vmem %s1423_s26, %s346_s20 [#allocation7]  ;;  %s373_s27 = sadd.s32 %s1278_s1, %s371_s17 }
  0xac   : >> { %v349_v8 = vld [vmem:[%s348_s5] sm:$0x1]  ;;  %s363_s8 = sld [smem:[#allocation6 + %s361_s10]]  ;;  %s798_s2 = sshll.u32 %s373_s27, 7 }
  0xad   : >> { %s350_s14 = scalar_lea.vmem [#allocation2], %s347_s28  ;;  %s376_s15 = sand.u32 127, %s370_s3 }
  0xae   : >> { %s386_s13 = sadd.s32 5, %s1449_s24  ;;  %s377_s23 = sadd.s32 %s798_s2, %s376_s15 }
  0xaf   : >> { %v335_v6 = vld [vmem:[%s334_s30] sm:$0x1]  ;;  %s387_s11 = sshra.s32 %s386_s13, 7  ;;  %s379_s18 = sld [smem:[#allocation6 + %s377_s23]] }
  0xb0   : >> { %v336_v7 = vadd.f32 %v335_v6, %v333_v5  ;;  %s364_s19 = scalar_lea.vmem %s1423_s26, %s362_s16 [#allocation7]  ;;  %s389_s20 = sadd.s32 %s1278_s1, %s387_s11 }
  0xb1   : >> { %v365_v11 = vld [vmem:[%s364_s19] sm:$0x1]  ;;  %s799_s28 = sshll.u32 %s389_s20, 7  ;;  %s392_s10 = sand.u32 127, %s386_s13 }
  0xb2   : >> { %337 = vst [vmem:[%s334_s30] sm:$0x1] %v336_v7  ;;  %s378_s30 = sld [smem:[#allocation5 + %s377_s23]]  ;;  %s366_s9 = scalar_lea.vmem [#allocation2], %s363_s8 }
  0xb3   : >> { %s402_s5 = sadd.s32 6, %s1449_s24  ;;  %s393_s3 = sadd.s32 %s799_s28, %s392_s10 }
  0xb4   : >> { %s403_s27 = sshra.s32 %s402_s5, 7  ;;  %s395_s2 = sld [smem:[#allocation6 + %s393_s3]] }
  0xb5   : >> { %s405_s16 = sadd.s32 %s1278_s1, %s403_s27  ;;  %s382_s15 = scalar_lea.vmem [#allocation2], %s379_s18 }
  0xb6   : >> { %s800_s8 = sshll.u32 %s405_s16, 7  ;;  %s408_s23 = sand.u32 127, %s402_s5 }
  0xb7   : >> { %s418_s19 = sadd.s32 7, %s1449_s24  ;;  %s409_s13 = sadd.s32 %s800_s8, %s408_s23 }
  0xb8   : >> { %s380_s17 = scalar_lea.vmem %s1423_s26, %s378_s30 [#allocation7]  ;;  %s419_s20 = sshra.s32 %s418_s19, 7 }
  0xb9   : >> { %v351_v9 = vld [vmem:[%s350_s14] sm:$0x1]  ;;  %s421_s30 = sadd.s32 %s1278_s1, %s419_s20  ;;  %s411_s28 = sld [smem:[#allocation6 + %s409_s13]] }
  0xba   : >> { %v352_v10 = vadd.f32 %v351_v9, %v349_v8  ;;  %v381_v14 = vld [vmem:[%s380_s17] sm:$0x1]  ;;  %s398_s10 = scalar_lea.vmem [#allocation2], %s395_s2  ;;  %s424_s18 = sand.u32 127, %s418_s19 }
  0xbb   : >> { %p302_p1 = scmp.ge.s32.totalorder %s305_s25, 8  }
  0xbc   : >> { %353 = vst [vmem:[%s350_s14] sm:$0x1] %v352_v10  ;;  %s394_s14 = sld [smem:[#allocation5 + %s393_s3]]  ;;  %s801_s3 = sshll.u32 %s421_s30, 7  ;;  %844 = vmatprep.subr.bf16.mxu0 (%p302_p1), %v1190_v1  ;;  %v968_v26 = vld [vmem:[%s1430_s12] sm:$0xff] (%p302_p1)   ;;  %vm1191_vm0 = vmmov (%p302_p1), 0   ;;  %v969_v27 = vld [vmem:[%s1430_s12 + $0x8] sm:$0xff] (%p302_p1)  }
  0xbd   : >> { %s425_s17 = sadd.s32 %s801_s3, %s424_s18  ;;  %860 = vmatprep.mubr.msk.bf16.mxu0 (%p302_p1), %vm1191_vm0, %v1190_v1  ;;  %845 = vmatpush3.bf16.msra.mxu0 (%p302_p1), %v968_v26  ;;  %v970_v28 = vld [vmem:[%s1430_s12 + $0x10] sm:$0xff] (%p302_p1)   ;;  %v971_v29 = vld [vmem:[%s1430_s12 + $0x18] sm:$0xff] (%p302_p1)   ;;  %v972_v30 = vld [vmem:[%s1430_s12 + $0x20] sm:$0xff] (%p302_p1)   ;;  %p810_p0 = scmp.ne.s32.totalorder (%p302_p1), %s1278_s1, 2 }
  0xbe   : >> { %s426_s5 = sld [smem:[#allocation5 + %s425_s17]]  ;;  %846 = vmatprep.subr.bf16.mxu0 (%p302_p1), %v1190_v1  ;;  %v973_v31 = vld [vmem:[%s1430_s12 + $0x28] sm:$0xff] (%p302_p1)   ;;  %v974_v32 = vld [vmem:[%s1430_s12 + $0x30] sm:$0xff] (%p302_p1)   ;;  %v975_v33 = vld [vmem:[%s1430_s12 + $0x38] sm:$0xff] (%p302_p1)  }
  0xbf   : >> { %s427_s24 = sld [smem:[#allocation6 + %s425_s17]]  ;;  %s414_s16 = scalar_lea.vmem [#allocation2], %s411_s28  ;;  %v434_v36 = vld [vmem:[#allocation3] sm:$0xff] (%p302_p1) }
  0xc1   : > { %847 = vmatpush3.bf16.msra.mxu0 (%p302_p1), %v969_v27 }
  0xc2   : >> { %s396_s11 = scalar_lea.vmem %s1423_s26, %s394_s14 [#allocation7]  ;;  %848 = vmatprep.subr.bf16.mxu0 (%p302_p1), %v1190_v1 }
  0xc3   : >> { %v367_v12 = vld [vmem:[%s366_s9] sm:$0x1] }
  0xc4   : >> { %v368_v13 = vadd.f32 %v367_v12, %v365_v11  ;;  %v397_v17 = vld [vmem:[%s396_s11] sm:$0x1]  ;;  %s428_s14 = scalar_lea.vmem %s1423_s26, %s426_s5 [#allocation7] }
  0xc5   : >> { %v429_v23 = vld [vmem:[%s428_s14] sm:$0x1]  ;;  %849 = vmatpush3.bf16.msra.mxu0 (%p302_p1), %v970_v28 }
  0xc6   : >> { %369 = vst [vmem:[%s366_s9] sm:$0x1] %v368_v13  ;;  %s410_s9 = sld [smem:[#allocation5 + %s409_s13]]  ;;  %850 = vmatprep.subr.bf16.mxu0 (%p302_p1), %v1190_v1 }
  0xc9   : > { %851 = vmatpush3.bf16.msra.mxu0 (%p302_p1), %v971_v29 }
  0xca   : > { %852 = vmatprep.subr.bf16.mxu0 (%p302_p1), %v1190_v1 }
  0xcc   : >> { %s412_s27 = scalar_lea.vmem %s1423_s26, %s410_s9 [#allocation7] }
  0xcd   : >> { %v383_v15 = vld [vmem:[%s382_s15] sm:$0x1]  ;;  %853 = vmatpush3.bf16.msra.mxu0 (%p302_p1), %v972_v30 }
  0xce   : >> { %v384_v16 = vadd.f32 %v383_v15, %v381_v14  ;;  %v413_v20 = vld [vmem:[%s412_s27] sm:$0x1]  ;;  %854 = vmatprep.subr.bf16.mxu0 (%p302_p1), %v1190_v1 }
  0xd0   : >> { %385 = vst [vmem:[%s382_s15] sm:$0x1] %v384_v16  ;;  %s430_s15 = scalar_lea.vmem [#allocation2], %s427_s24 }
  0xd1   : > { %855 = vmatpush3.bf16.msra.mxu0 (%p302_p1), %v973_v31 }
  0xd2   : > { %856 = vmatprep.subr.bf16.mxu0 (%p302_p1), %v1190_v1 }
  0xd5   : > { %857 = vmatpush3.bf16.msra.mxu0 (%p302_p1), %v974_v32 }
  0xd6   : > { %858 = vmatprep.subr.bf16.mxu0 (%p302_p1), %v1190_v1 }
  0xd7   : >> { %v399_v18 = vld [vmem:[%s398_s10] sm:$0x1] }
  0xd8   : >> { %v400_v19 = vadd.f32 %v399_v18, %v397_v17 }
  0xd9   : > { %859 = vmatpush3.bf16.msra.mxu0 (%p302_p1), %v975_v33 }
  0xda   : >> { %401 = vst [vmem:[%s398_s10] sm:$0x1] %v400_v19 }
  0xe1   : >> { %v415_v21 = vld [vmem:[%s414_s16] sm:$0x1] }
  0xe2   : >> { %v416_v22 = vadd.f32 %v415_v21, %v413_v20 }
  0xe4   : >> { %417 = vst [vmem:[%s414_s16] sm:$0x1] %v416_v22 }
  0xe8   : > { %304 = sbr.rel (!%p302_p1) target bundleno = 152 (0x98), region = 125 }
  0xeb   : >> { %v431_v24 = vld [vmem:[%s430_s15] sm:$0x1] }
  0xec   : >> { %v432_v25 = vadd.f32 %v431_v24, %v429_v23 }
  0xee   : >> { %433 = vst [vmem:[%s430_s15] sm:$0x1] %v432_v25 }
  0xef   : > { %v976_v42 = vld [vmem:[#allocation12] sm:$0xff] (!%p810_p0)   ;;  %v1192_v43 = vmov (!%p810_p0), 0.0   ;;  %v977_v44 = vld [vmem:[#allocation12 + $0x8] sm:$0xff] (!%p810_p0)   ;;  %vm1193_vm1 = vmmov (!%p810_p0), 0   ;;  %v978_v45 = vld [vmem:[#allocation12 + $0x10] sm:$0xff] (!%p810_p0)  }
  0xf0   : > { %864 = vmatprep.subr.bf16.mxu0 (!%p810_p0), %v1192_v43  ;;  %v811_v47 = vld [vmem:[%s1542_s4] ss:$0 sm:$0xff] (!%p810_p0)  ;;  %v979_v48 = vld [vmem:[#allocation12 + $0x18] sm:$0xff] (!%p810_p0)   ;;  %v981_v51 = vld [vmem:[#allocation12 + $0x28] sm:$0xff] (!%p810_p0)  }
  0xf1   : > { %v980_v50 = vld [vmem:[#allocation12 + $0x20] sm:$0xff] (!%p810_p0)   ;;  %v982_v52 = vld [vmem:[#allocation12 + $0x30] sm:$0xff] (!%p810_p0)   ;;  %v983_v54 = vld [vmem:[#allocation12 + $0x38] sm:$0xff] (!%p810_p0)  }
  0xf2   : > { %v812_v56 = vld [vmem:[%s1544_s6] ss:$0 sm:$0xff] (!%p810_p0) }
  0xf5   : > { %v435_v34 = vld [vmem:[#allocation2] sm:$0xff] }
  0xf6   : > { %v436_v35 = vpack.c.bf16 %v435_v34, %v435_v34 }
  0xf8   : > { %861 = vmatmul.mubr.bf16.vlgmr.msra.gmra.mrb[0].mxu0 %v436_v35 }
  0xf9   : > { %865 = vmatpush3.bf16.msra.mxu0 (!%p810_p0), %v976_v42  ;;  %880 = vmatprep.mubr.msk.bf16.mxu0 (!%p810_p0), %vm1193_vm1, %v1192_v43 }
  0xfa   : > { %866 = vmatprep.subr.bf16.mxu0 (!%p810_p0), %v1192_v43 }
  0xfd   : > { %867 = vmatpush3.bf16.msra.mxu0 (!%p810_p0), %v977_v44 }
  0xfe   : > { %868 = vmatprep.subr.bf16.mxu0 (!%p810_p0), %v1192_v43 }
 0x101   : > { %869 = vmatpush3.bf16.msra.mxu0 (!%p810_p0), %v978_v45 }
 0x102   : > { %870 = vmatprep.subr.bf16.mxu0 (!%p810_p0), %v1192_v43 }
 0x105   : > { %871 = vmatpush3.bf16.msra.mxu0 (!%p810_p0), %v979_v48 }
 0x106   : > { %872 = vmatprep.subr.bf16.mxu0 (!%p810_p0), %v1192_v43 }
 0x109   : > { %873 = vmatpush3.bf16.msra.mxu0 (!%p810_p0), %v980_v50 }
 0x10a   : > { %874 = vmatprep.subr.bf16.mxu0 (!%p810_p0), %v1192_v43 }
 0x10d   : > { %875 = vmatpush3.bf16.msra.mxu0 (!%p810_p0), %v981_v51 }
 0x10e   : > { %876 = vmatprep.subr.bf16.mxu0 (!%p810_p0), %v1192_v43 }
 0x111   : > { %877 = vmatpush3.bf16.msra.mxu0 (!%p810_p0), %v982_v52 }
 0x112   : > { %878 = vmatprep.subr.bf16.mxu0 (!%p810_p0), %v1192_v43 }
 0x115   : > { %879 = vmatpush3.bf16.msra.mxu0 (!%p810_p0), %v983_v54 }
 0x1c8   : > { %546 = sbr.rel (%p810_p0) target bundleno = 711 (0x2c7), region = 67 }
 0x1cb   : > { %v535_v37 = vpop.f32.mrb[0].mxu0 }
 0x1cc   : > { %v541_v38 = vadd.f32 %v535_v37, %v434_v36  ;;  %v862_v39 = vpop.f32.mrb[1].mxu0 }
 0x1cd   : > { %v538_v40 = vpop.f32.mrb[2].mxu0 }
 0x1ce   : > { %542 = vst [vmem:[#allocation3] sm:$0xff] %v541_v38  ;;  %v863_v41 = vpop.f32.mrb[3].mxu0 }
 0x1d5   : > { %v547_v46 = vld [vmem:[#allocation3] sm:$0xff] }
 0x1d6   : > { %v555_v49 = vadd.f32 %v811_v47, %v547_v46 }
 0x1d8   : > { %984 = vtanh.f32 %v555_v49 }
 0x1e2   : > { %v985_v53 = vpop.eup %984 }
 0x1e3   : > { %v557_v55 = vpack.c.bf16 %v985_v53, %v985_v53 }
 0x1e5   : > { %881 = vmatmul.mubr.bf16.vlgmr.msra.gmra.mrb[0].mxu0 %v557_v55 }
 0x2b8   : > { %v663_v57 = vpop.f32.mrb[0].mxu0 }
 0x2b9   : > { %v664_v58 = vadd.f32 %v812_v56, %v663_v57  ;;  %v882_v59 = vpop.f32.mrb[1].mxu0 }
 0x2ba   : > { %v666_v60 = vpop.f32.mrb[2].mxu0 }
 0x2bb   : > { %986 = vtanh.f32 %v664_v58  ;;  %v883_v61 = vpop.f32.mrb[3].mxu0 }
 0x2c5   : > { %v987_v62 = vpop.eup %986 }
 0x2c6   : > { %670 = vst [vmem:[#allocation13] sm:$0xff] %v987_v62 }
 0x2c7 PF: > { %p913_p4 = scmp.eq.s32.totalorder %s1278_s1, 2  ;;  %s1194_s8 = smov [#allocation13]  }
 0x2c8   : > { %s678_s23 = sshll.u32 %s1194_s8, 4  ;;  %s679_s23 = int_to_ptr.vmem [resolvable:$true] %s678_s23 }
 0x2c9   : > { %s1096_s19 = scalar_lea.vmem %s679_s23, 128  ;;  %p1103_p9 = scmp.lt.s32.totalorder %s679_s23, %s679_s23 }
 0x2ca   : > { %p1097_p6 = scmp.ne.s32.totalorder %s679_s23, %s1096_s19  ;;  %p1104_p7 = scmp.lt.s32.totalorder %s1096_s19, %s1096_s19 }
 0x2cc   : > { %p1098_p8 = pnand %p1097_p6, %p913_p4  ;;  %p1105_p10 = por %p1104_p7, %p1103_p9 }
 0x2ce   : > { %p1099_p5 = pneg %p1098_p8 }
 0x2d0   : > { %p1106_p3 = pnand %p1105_p10, %p1099_p5 }
 0x2d2   : > { %1109 = shalt.err (!%p1106_p3)
}
 0x2d3   : > { %s1110_s20 = scalar_lea.hbm %s1545_s7, 128 }
 0x2d4   : > { %p1111_p13 = scmp.ne.s32.totalorder %s1545_s7, %s1110_s20  ;;  %p1116_p12 = scmp.lt.u32.totalorder %s1110_s20, %s1545_s7 }
 0x2d6   : > { %p1112_p2 = pnand %p1111_p13, %p913_p4 }
 0x2d8   : > { %p1113_p11 = pneg %p1112_p2 }
 0x2da   : > { %p1118_p1 = pnand %p1116_p12, %p1113_p11 }
 0x2dc   : > { %1121 = shalt.err (!%p1118_p1)
}
 0x2dd   : > { %896 = dma.vmem_to_hbm [thread:$0]  (%p913_p4), %s679_s23, 128, %s1545_s7, [#allocation9]  }
 0x2de   : > { %1157 = dma.done.wait (%p913_p4), [#allocation9], 128  }
 0x2df   : > { %1159 = vsyncadd (%p913_p4), [#allocation9], 4294967168 }
 0x2e0 PF: > { %s1569_s17 = smov %s1333_s0  ;;  %p27_p0 = scmp.ge.s32.totalorder %s1304_s29, 5  }
 0x2e1   : > { %s1570_s0 = smov %s1166_s21  ;;  %s1571_s21 = smov %s1170_s22 }
 0x2e2   : > { %s1572_s22 = smov %s1569_s17  ;;  %s1573_s23 = smov %s1304_s29 }
 0x2e3   :  { %29 = sbr.rel (!%p27_p0) target bundleno = 26 (0x1a), region = 136 }
 0x2ea   :  { %691 = vsyncpa [#allocation8], 1 }
 0x2eb   :  { %693 = vsyncpa [#allocation8 + $0x1], 1 }
 0x2ec   :  { %694 = vsyncpa [#allocation11], 1 }
 0x2ed   :  { %696 = vsyncpa [#allocation11 + $0x1], 1 }
 0x2ee   :  { %697 = vsyncpa [#allocation9], 1 }
 0x2ef   :  { %699 = vsyncpa [#allocation9 + $0x1], 1 }

</bundles_post_ra>
